<compile_context>
chip_gen: v5e
topology: v5e:2x2
jax: 0.10.0
libtpu: 0.0.40
codegen_flags: <defaults>
</compile_context>

<pallas_src>
import jax
import jax.numpy as jnp
from jax import lax
from jax.experimental import pallas as pl
from jax.experimental.pallas import tpu as pltpu

_HID = 128        # lane-dense padded hidden width (true hiddens are 64/32/8)
_SUB_ROWS = 256   # rows per inner sub-chunk (keeps live intermediates small)


def _round_up(v, m):
    return ((v + m - 1) // m) * m


def _pad2(a, rows, cols):
    return jnp.pad(a, ((0, rows - a.shape[0]), (0, cols - a.shape[1])))


def _make_kernel(sub, n_sub):
    """Fused 4-layer MLP kernel over a (n_sub * sub)-row batch tile."""

    def kernel(x_ref, w1_ref, b1_ref, w2_ref, b2_ref, w3_ref, b3_ref,
               w4_ref, b4_ref, o_ref):

        def layer(h_bf16, w_ref, b_ref):
            acc = jnp.dot(h_bf16, w_ref[...], preferred_element_type=jnp.float32)
            return jnp.maximum(acc + b_ref[...], 0.0)   # f32 bias add + ReLU

        def body(j, carry):
            r = pl.multiple_of(j * sub, sub)
            # in-kernel f32 -> bf16 cast of the streamed x sub-chunk
            x = x_ref[pl.ds(r, sub), :].astype(jnp.bfloat16)
            h = layer(x, w1_ref, b1_ref).astype(jnp.bfloat16)
            h = layer(h, w2_ref, b2_ref).astype(jnp.bfloat16)
            h = layer(h, w3_ref, b3_ref).astype(jnp.bfloat16)
            h = layer(h, w4_ref, b4_ref)   # final ReLU is part of NN_V.forward
            o_ref[pl.ds(r, sub), :] = h.astype(o_ref.dtype)
            return carry

        if n_sub == 1:
            body(0, 0)
        else:
            lax.fori_loop(0, n_sub, body, 0, unroll=True)

    return kernel


def prepare_params(params):
    """One-time weight prep (call once, reuse every forward):
    pad hidden dims to 128 lanes (exact: zero rows/cols + ReLU(0)=0),
    cast matmul weights to bf16, keep biases f32."""
    (w1, b1), (w2, b2), (w3, b3), (w4, b4) = params
    i_dim, o_dim = w1.shape[0], w4.shape[1]
    return (
        _pad2(w1, i_dim, _HID).astype(jnp.bfloat16), _pad2(b1, 1, _HID).astype(jnp.float32),
        _pad2(w2, _HID, _HID).astype(jnp.bfloat16), _pad2(b2, 1, _HID).astype(jnp.float32),
        _pad2(w3, _HID, _HID).astype(jnp.bfloat16), _pad2(b3, 1, _HID).astype(jnp.float32),
        _pad2(w4, _HID, o_dim).astype(jnp.bfloat16), b4.astype(jnp.float32),
    )


def nn_v_forward(x, prepared, *, tile_b=2048):
    """Fused NN_V forward. x: [B, i_dim] f32; prepared = prepare_params(params).
    Returns [B, o_dim] f32."""
    w1p, b1p, w2p, b2p, w3p, b3p, w4p, b4p = prepared
    B, i_dim = x.shape
    o_dim = w4p.shape[1]

    # --- batch tiling (multiples of 16; no host-side pad of x) ---
    tile_b = _round_up(max(16, min(tile_b, _round_up(B, 16))), 16)
    # v7x megacore: prefer >=2 grid steps over one mega-tile when B allows it
    if B > 16 and pl.cdiv(B, tile_b) < 2:
        tile_b = max(16, _round_up(pl.cdiv(B, 2), 16))
    sub = min(_SUB_ROWS, tile_b)
    tile_b = _round_up(tile_b, sub)
    n_sub = tile_b // sub
    nb = pl.cdiv(B, tile_b)

    def wspec(shp):
        # grid-invariant index map -> weights/biases stay VMEM-resident
        return pl.BlockSpec(shp, lambda i: (0, 0))

    flops = 2 * B * (i_dim * _HID + 2 * _HID * _HID + _HID * o_dim)
    bytes_accessed = (B * i_dim * 4 + B * o_dim * 4
                      + 2 * (i_dim * _HID + 2 * _HID * _HID + _HID * o_dim)
                      + 4 * (3 * _HID + o_dim))

    return pl.pallas_call(
        _make_kernel(sub, n_sub),
        out_shape=jax.ShapeDtypeStruct((B, o_dim), jnp.float32),
        grid=(nb,),
        in_specs=[
            pl.BlockSpec((tile_b, i_dim), lambda i: (i, 0)),   # streamed f32 x tiles
            wspec((i_dim, _HID)), wspec((1, _HID)),
            wspec((_HID, _HID)), wspec((1, _HID)),
            wspec((_HID, _HID)), wspec((1, _HID)),
            wspec((_HID, o_dim)), wspec((1, o_dim)),
        ],
        out_specs=pl.BlockSpec((tile_b, o_dim), lambda i: (i, 0)),
        compiler_params=pltpu.CompilerParams(
            dimension_semantics=("parallel",)),   # v7x: batch across both TCs
        cost_estimate=pl.CostEstimate(
            flops=int(flops), transcendentals=0, bytes_accessed=int(bytes_accessed)),
    )(x, w1p, b1p, w2p, b2p, w3p, b3p, w4p, b4p)


def init_params(key, i_dim, o_dim):
    """nn.Linear-style init (uniform +/- 1/sqrt(fan_in)); weights stored [in, out]."""
    dims = [(i_dim, 64), (64, 32), (32, 8), (8, o_dim)]
    params = []
    for (fan_in, fan_out) in dims:
        key, kw, kb = jax.random.split(key, 3)
        bound = 1.0 / jnp.sqrt(jnp.float32(fan_in))
        w = jax.random.uniform(kw, (fan_in, fan_out), jnp.float32, -bound, bound)
        b = jax.random.uniform(kb, (1, fan_out), jnp.float32, -bound, bound)
        params.append((w, b))
    return params


def nn_v_reference(x, params):
    """Pure-JAX reference mirroring the kernel's bf16-operand / f32-accumulate math."""
    h = x
    for (w, b) in params:
        lhs = h.astype(jnp.bfloat16).astype(jnp.float32)
        rhs = w.astype(jnp.bfloat16).astype(jnp.float32)
        h = jnp.maximum(lhs @ rhs + b, 0.0)
    return h


if __name__ == "__main__":
    key = jax.random.PRNGKey(0)
    i_dim, o_dim = 16, 4

    kp, kx1, kx2 = jax.random.split(key, 3)
    params = init_params(kp, i_dim, o_dim)
    prepared = prepare_params(params)          # one-time weight prep

    # Case 1: small batch -> single sub-chunk path, 2 grid steps.
    x_small = jax.random.normal(kx1, (32, i_dim), jnp.float32)
    out_small = jax.block_until_ready(nn_v_forward(x_small, prepared))
    ref_small = nn_v_reference(x_small, params)
    assert out_small.shape == (32, o_dim)
    assert jnp.allclose(out_small, ref_small, atol=2e-3, rtol=2e-3), "mismatch (small)"

    # Case 2: larger batch -> inner fori_loop sub-chunk path, 2 grid steps.
    x_large = jax.random.normal(kx2, (1024, i_dim), jnp.float32)
    out_large = jax.block_until_ready(nn_v_forward(x_large, prepared))
    ref_large = nn_v_reference(x_large, params)
    assert out_large.shape == (1024, o_dim)
    assert jnp.allclose(out_large, ref_large, atol=2e-3, rtol=2e-3), "mismatch (large)"

    print("KERNEL_OK")
</pallas_src>

<mosaic_0001>
module attributes {stable_mosaic.version = 11 : i64} {
  func.func @kernel(%arg0: i32, %arg1: memref<16x16xf32, #tpu.memory_space<vmem>>, %arg2: memref<16x128xbf16, #tpu.memory_space<vmem>>, %arg3: memref<1x128xf32, #tpu.memory_space<vmem>>, %arg4: memref<128x128xbf16, #tpu.memory_space<vmem>>, %arg5: memref<1x128xf32, #tpu.memory_space<vmem>>, %arg6: memref<128x128xbf16, #tpu.memory_space<vmem>>, %arg7: memref<1x128xf32, #tpu.memory_space<vmem>>, %arg8: memref<128x4xbf16, #tpu.memory_space<vmem>>, %arg9: memref<1x4xf32, #tpu.memory_space<vmem>>, %arg10: memref<16x4xf32, #tpu.memory_space<vmem>>) attributes {dimension_semantics = [#tpu.dimension_semantics<parallel>], iteration_bounds = array<i64: 2>, scalar_prefetch = 0 : i64, scratch_operands = 0 : i64, tpu.core_type = #tpu.core_type<tc>, window_params = [{transform_indices = @transform_0, window_bounds = array<i64: 16, 16>}, {pipeline_mode = #tpu.pipeline_mode<synchronous>, transform_indices = @transform_1, window_bounds = array<i64: 16, 128>}, {pipeline_mode = #tpu.pipeline_mode<synchronous>, transform_indices = @transform_2, window_bounds = array<i64: 1, 128>}, {pipeline_mode = #tpu.pipeline_mode<synchronous>, transform_indices = @transform_3, window_bounds = array<i64: 128, 128>}, {pipeline_mode = #tpu.pipeline_mode<synchronous>, transform_indices = @transform_4, window_bounds = array<i64: 1, 128>}, {pipeline_mode = #tpu.pipeline_mode<synchronous>, transform_indices = @transform_5, window_bounds = array<i64: 128, 128>}, {pipeline_mode = #tpu.pipeline_mode<synchronous>, transform_indices = @transform_6, window_bounds = array<i64: 1, 128>}, {pipeline_mode = #tpu.pipeline_mode<synchronous>, transform_indices = @transform_7, window_bounds = array<i64: 128, 4>}, {pipeline_mode = #tpu.pipeline_mode<synchronous>, transform_indices = @transform_8, window_bounds = array<i64: 1, 4>}, {transform_indices = @transform_9, window_bounds = array<i64: 16, 4>}]} {
    %c0_i32 = arith.constant 0 : i32
    %0 = tpu.assume_multiple %c0_i32, 16 : i32
    %1 = arith.index_cast %0 : i32 to index
    %c0 = arith.constant 0 : index
    %2 = vector.load %arg1[%1, %c0] : memref<16x16xf32, #tpu.memory_space<vmem>>, vector<16x16xf32>
    %3 = arith.truncf %2 : vector<16x16xf32> to vector<16x16xbf16>
    %c0_0 = arith.constant 0 : index
    %c0_1 = arith.constant 0 : index
    %4 = vector.load %arg2[%c0_0, %c0_1] : memref<16x128xbf16, #tpu.memory_space<vmem>>, vector<16x128xbf16>
    %cst = arith.constant dense<0.000000e+00> : vector<16x128xf32>
    %5 = tpu.matmul %3, %4, %cst {dimension_numbers = #tpu.dot_dimension_numbers<[1], [0], [0], [1], [0, 0, 1, 1], [], []>} : vector<16x16xbf16>, vector<16x128xbf16>, vector<16x128xf32> -> vector<16x128xf32>
    %c0_2 = arith.constant 0 : index
    %c0_3 = arith.constant 0 : index
    %6 = vector.load %arg3[%c0_2, %c0_3] : memref<1x128xf32, #tpu.memory_space<vmem>>, vector<1x128xf32>
    %7 = vector.broadcast %6 : vector<1x128xf32> to vector<16x128xf32>
    %8 = arith.addf %5, %7 : vector<16x128xf32>
    %cst_4 = arith.constant 0.000000e+00 : f32
    %9 = vector.broadcast %cst_4 : f32 to vector<16x128xf32>
    %10 = arith.maximumf %8, %9 : vector<16x128xf32>
    %11 = arith.truncf %10 : vector<16x128xf32> to vector<16x128xbf16>
    %c0_5 = arith.constant 0 : index
    %c0_6 = arith.constant 0 : index
    %12 = vector.load %arg4[%c0_5, %c0_6] : memref<128x128xbf16, #tpu.memory_space<vmem>>, vector<128x128xbf16>
    %cst_7 = arith.constant dense<0.000000e+00> : vector<16x128xf32>
    %13 = tpu.matmul %11, %12, %cst_7 {dimension_numbers = #tpu.dot_dimension_numbers<[1], [0], [0], [1], [0, 0, 1, 1], [], []>} : vector<16x128xbf16>, vector<128x128xbf16>, vector<16x128xf32> -> vector<16x128xf32>
    %c0_8 = arith.constant 0 : index
    %c0_9 = arith.constant 0 : index
    %14 = vector.load %arg5[%c0_8, %c0_9] : memref<1x128xf32, #tpu.memory_space<vmem>>, vector<1x128xf32>
    %15 = vector.broadcast %14 : vector<1x128xf32> to vector<16x128xf32>
    %16 = arith.addf %13, %15 : vector<16x128xf32>
    %cst_10 = arith.constant 0.000000e+00 : f32
    %17 = vector.broadcast %cst_10 : f32 to vector<16x128xf32>
    %18 = arith.maximumf %16, %17 : vector<16x128xf32>
    %19 = arith.truncf %18 : vector<16x128xf32> to vector<16x128xbf16>
    %c0_11 = arith.constant 0 : index
    %c0_12 = arith.constant 0 : index
    %20 = vector.load %arg6[%c0_11, %c0_12] : memref<128x128xbf16, #tpu.memory_space<vmem>>, vector<128x128xbf16>
    %cst_13 = arith.constant dense<0.000000e+00> : vector<16x128xf32>
    %21 = tpu.matmul %19, %20, %cst_13 {dimension_numbers = #tpu.dot_dimension_numbers<[1], [0], [0], [1], [0, 0, 1, 1], [], []>} : vector<16x128xbf16>, vector<128x128xbf16>, vector<16x128xf32> -> vector<16x128xf32>
    %c0_14 = arith.constant 0 : index
    %c0_15 = arith.constant 0 : index
    %22 = vector.load %arg7[%c0_14, %c0_15] : memref<1x128xf32, #tpu.memory_space<vmem>>, vector<1x128xf32>
    %23 = vector.broadcast %22 : vector<1x128xf32> to vector<16x128xf32>
    %24 = arith.addf %21, %23 : vector<16x128xf32>
    %cst_16 = arith.constant 0.000000e+00 : f32
    %25 = vector.broadcast %cst_16 : f32 to vector<16x128xf32>
    %26 = arith.maximumf %24, %25 : vector<16x128xf32>
    %27 = arith.truncf %26 : vector<16x128xf32> to vector<16x128xbf16>
    %c0_17 = arith.constant 0 : index
    %c0_18 = arith.constant 0 : index
    %28 = vector.load %arg8[%c0_17, %c0_18] : memref<128x4xbf16, #tpu.memory_space<vmem>>, vector<128x4xbf16>
    %cst_19 = arith.constant dense<0.000000e+00> : vector<16x4xf32>
    %29 = tpu.matmul %27, %28, %cst_19 {dimension_numbers = #tpu.dot_dimension_numbers<[1], [0], [0], [1], [0, 0, 1, 1], [], []>} : vector<16x128xbf16>, vector<128x4xbf16>, vector<16x4xf32> -> vector<16x4xf32>
    %c0_20 = arith.constant 0 : index
    %c0_21 = arith.constant 0 : index
    %30 = vector.load %arg9[%c0_20, %c0_21] : memref<1x4xf32, #tpu.memory_space<vmem>>, vector<1x4xf32>
    %31 = vector.broadcast %30 : vector<1x4xf32> to vector<16x4xf32>
    %32 = arith.addf %29, %31 : vector<16x4xf32>
    %cst_22 = arith.constant 0.000000e+00 : f32
    %33 = vector.broadcast %cst_22 : f32 to vector<16x4xf32>
    %34 = arith.maximumf %32, %33 : vector<16x4xf32>
    %35 = arith.index_cast %0 : i32 to index
    %c0_23 = arith.constant 0 : index
    %36 = vector.load %arg10[%35, %c0_23] : memref<16x4xf32, #tpu.memory_space<vmem>>, vector<16x4xf32>
    tpu.vector_store %arg10[%35, %c0_23], %34 {strides = array<i32>} : memref<16x4xf32, #tpu.memory_space<vmem>>, vector<16x4xf32>,
    return
  }
  func.func @transform_0(%arg0: i32) -> (i32, i32) {
    %c0_i32 = arith.constant 0 : i32
    %c0_i32_0 = arith.constant 0 : i32
    return %arg0, %c0_i32 : i32, i32
  }
  func.func @transform_1(%arg0: i32) -> (i32, i32) {
    %c0_i32 = arith.constant 0 : i32
    %c0_i32_0 = arith.constant 0 : i32
    %c0_i32_1 = arith.constant 0 : i32
    return %c0_i32, %c0_i32_0 : i32, i32
  }
  func.func @transform_2(%arg0: i32) -> (i32, i32) {
    %c0_i32 = arith.constant 0 : i32
    %c0_i32_0 = arith.constant 0 : i32
    %c0_i32_1 = arith.constant 0 : i32
    return %c0_i32, %c0_i32_0 : i32, i32
  }
  func.func @transform_3(%arg0: i32) -> (i32, i32) {
    %c0_i32 = arith.constant 0 : i32
    %c0_i32_0 = arith.constant 0 : i32
    %c0_i32_1 = arith.constant 0 : i32
    return %c0_i32, %c0_i32_0 : i32, i32
  }
  func.func @transform_4(%arg0: i32) -> (i32, i32) {
    %c0_i32 = arith.constant 0 : i32
    %c0_i32_0 = arith.constant 0 : i32
    %c0_i32_1 = arith.constant 0 : i32
    return %c0_i32, %c0_i32_0 : i32, i32
  }
  func.func @transform_5(%arg0: i32) -> (i32, i32) {
    %c0_i32 = arith.constant 0 : i32
    %c0_i32_0 = arith.constant 0 : i32
    %c0_i32_1 = arith.constant 0 : i32
    return %c0_i32, %c0_i32_0 : i32, i32
  }
  func.func @transform_6(%arg0: i32) -> (i32, i32) {
    %c0_i32 = arith.constant 0 : i32
    %c0_i32_0 = arith.constant 0 : i32
    %c0_i32_1 = arith.constant 0 : i32
    return %c0_i32, %c0_i32_0 : i32, i32
  }
  func.func @transform_7(%arg0: i32) -> (i32, i32) {
    %c0_i32 = arith.constant 0 : i32
    %c0_i32_0 = arith.constant 0 : i32
    %c0_i32_1 = arith.constant 0 : i32
    return %c0_i32, %c0_i32_0 : i32, i32
  }
  func.func @transform_8(%arg0: i32) -> (i32, i32) {
    %c0_i32 = arith.constant 0 : i32
    %c0_i32_0 = arith.constant 0 : i32
    %c0_i32_1 = arith.constant 0 : i32
    return %c0_i32, %c0_i32_0 : i32, i32
  }
  func.func @transform_9(%arg0: i32) -> (i32, i32) {
    %c0_i32 = arith.constant 0 : i32
    %c0_i32_0 = arith.constant 0 : i32
    return %arg0, %c0_i32 : i32, i32
  }
}

</mosaic_0001>

<bundles_post_ra>
// kernel: tpu_custom_call.1
= control target key start
LH: loop header
LB: loop body
LE: loop exit
PB: predicated region body
PF: predicated region fallthrough
CT: control target
= control target key end

     0   :  { %14 = vsyncpa [#allocation3], 0  ;;  %s974_s30 = smov 0   ;;  %s1064_s0 = inlined_call_operand.vmem [shape: f32[32,16], index: 0, kind: input, shape index: {}]   ;;  %s1065_s1 = inlined_call_operand.vmem [shape: bf16[16,128], index: 1, kind: input, shape index: {}]   ;;  %s1066_s2 = inlined_call_operand.vmem [shape: f32[1,128], index: 2, kind: input, shape index: {}]   ;;  %s1067_s3 = inlined_call_operand.vmem [shape: bf16[128,128], index: 3, kind: input, shape index: {}]   ;;  %s1068_s4 = inlined_call_operand.vmem [shape: f32[1,128], index: 4, kind: input, shape index: {}]   ;;  %s1069_s5 = inlined_call_operand.hbm [shape: bf16[128,128], index: 5, kind: input, shape index: {}]   ;;  %s1070_s6 = inlined_call_operand.vmem [shape: f32[1,128], index: 6, kind: input, shape index: {}]   ;;  %s1071_s7 = inlined_call_operand.vmem [shape: bf16[128,4], index: 7, kind: input, shape index: {}]   ;;  %s1072_s8 = inlined_call_operand.vmem [shape: f32[1,4], index: 8, kind: input, shape index: {}]   ;;  %s1073_s9 = inlined_call_operand.vmem [shape: f32[32,4], index: 9, kind: output, shape index: {}]  }
   0x1 LB: > { %s268_s12 = sshll.u32 %s1069_s5, 4  ;;  %s715_s13 = sadd.s32 4294967295, %s919_s30   ;;  %s919_s30 = sphi %s974_s30, %s20_s30   ;;  %s269_s12 = int_to_ptr.hbm [resolvable:$true] %s268_s12 }
   0x2   : > { %p717_p0 = scmp.ge.s32.totalorder %s919_s30, 1  ;;  %p245_p1 = scmp.lt.s32.totalorder %s919_s30, 3 }
   0x3   : > { %p862_p2 = scmp.eq.s32.totalorder %s715_s13, 0  ;;  %s921_s14 = smov [#allocation2]  }
   0x4   : > { %p246_p3 = pnand %p717_p0, %p245_p1  ;;  %s270_s15 = sshll.u32 %s921_s14, 4  ;;  %s271_s15 = int_to_ptr.vmem [resolvable:$true] %s270_s15 }
   0x5   : > { %s922_s16 = smov 64   ;;  %s923_s17 = smov 4  }
   0x6   : > { %p858_p4 = pneg %p246_p3  ;;  %304 = sbr.rel (%p246_p3) target bundleno = 592 (0x250), region = 56 }
   0x8   : > { %p859_p5 = pnand %p862_p2, %p858_p4 }
   0xa   : > { %861 = dma.hbm_to_vmem [thread:$0]  (!%p859_p5), %s269_s12, 1024, %s271_s15, [#allocation3], %s922_s16, %s922_s16, %s923_s17  }
   0xb   : > { %914 = dma.done.wait (%p862_p2), [#allocation3], 1024  }
   0xc   : > { %916 = vsyncadd (%p862_p2), [#allocation3], 4294966272  ;;  %s722_s18 = sshll.u32 %s715_s13, 1  ;;  %v829_v0 = vld [vmem:[%s1065_s1] sm:$0xff]  ;;  %v837_v4 = vld [vmem:[%s1067_s3 + $0x38] sm:$0xff]  ;;  %vm369_vm0 = vcmask 130048  }
   0xd   : > { %p342_p6 = scmp.lt.s32.totalorder %s722_s18, 3  ;;  %380 = vmatpush.bf16.msra.mxu0 %v829_v0  ;;  %v836_v5 = vld [vmem:[%s1067_s3 + $0x30] sm:$0xff]  ;;  %458 = vmatpush.bf16.msra.mxu1 %v837_v4  ;;  %v835_v6 = vld [vmem:[%s1067_s3 + $0x28] sm:$0xff]  ;;  %v834_v7 = vld [vmem:[%s1067_s3 + $0x20] sm:$0xff]  ;;  %vm644_vm1 = vcmask 31744  }
   0xe   : > { %v833_v8 = vld [vmem:[%s1067_s3 + $0x18] sm:$0xff]  ;;  %v832_v9 = vld [vmem:[%s1067_s3 + $0x10] sm:$0xff]  ;;  %v831_v10 = vld [vmem:[%s1067_s3 + $0x8] sm:$0xff] }
   0xf   : > { %s1075_s18 = smov (!%p342_p6, %s722_s18), 3  ;;  %v830_v11 = vld [vmem:[%s1067_s3] sm:$0xff]  ;;  %v845_v12 = vld [vmem:[#allocation2 + $0x38] sm:$0xff]  ;;  %v844_v13 = vld [vmem:[#allocation2 + $0x30] sm:$0xff] }
  0x10   : > { %s723_s19 = sshll.u32 %s1075_s18, 3  ;;  %543 = vmatpush.bf16.msra.mxu2 %v845_v12  ;;  %v843_v14 = vld [vmem:[#allocation2 + $0x28] sm:$0xff]  ;;  %v842_v15 = vld [vmem:[#allocation2 + $0x20] sm:$0xff]  ;;  %v841_v24 = vld [vmem:[#allocation2 + $0x18] sm:$0xff] }
  0x11   : > { %s345_s22 = scalar_lea.vmem %s1064_s0, %s723_s19  ;;  %459 = vmatpush.bf16.msra.mxu1 %v836_v5  ;;  %v875_v17 = vld [vmem:[%s1066_s2] ss:$0 sm:$0xff]  ;;  %v840_v25 = vld [vmem:[#allocation2 + $0x10] sm:$0xff]  ;;  %v839_v26 = vld [vmem:[#allocation2 + $0x8] sm:$0xff]  ;;  %s351_s11 = scalar_lea.vmem %s1073_s9, %s723_s19 }
  0x12   : > { %v354_v1 = vld [vmem:[%s345_s22] sm:$0xff]  ;;  %v355_v2 = vld [vmem:[%s345_s22 + $0x8] sm:$0xff]  ;;  %v853_v28 = vld [vmem:[%s1071_s7 + $0x38] sm:$0xff] }
  0x13   : > { %v356_v3 = vpack.c.bf16 %v355_v2, %v354_v1  ;;  %v838_v27 = vld [vmem:[#allocation2] sm:$0xff]  ;;  %628 = vmatpush.bf16.msra.mxu3 %v853_v28  ;;  %v852_v29 = vld [vmem:[%s1071_s7 + $0x30] sm:$0xff]  ;;  %v851_v30 = vld [vmem:[%s1071_s7 + $0x28] sm:$0xff] }
  0x14   : > { %544 = vmatpush.bf16.msra.mxu2 %v844_v13  ;;  %v850_v31 = vld [vmem:[%s1071_s7 + $0x20] sm:$0xff]  ;;  %v849_v40 = vld [vmem:[%s1071_s7 + $0x18] sm:$0xff]  ;;  %v848_v41 = vld [vmem:[%s1071_s7 + $0x10] sm:$0xff] }
  0x15   : > { %730 = vmatmul.msk.bf16.vlgmr.msra.gmra.mxu0 %vm369_vm0, %v356_v3  ;;  %460 = vmatpush.bf16.msra.mxu1 %v835_v6  ;;  %v876_v33 = vld [vmem:[%s1068_s4] ss:$0 sm:$0xff]  ;;  %v847_v42 = vld [vmem:[%s1071_s7 + $0x8] sm:$0xff] }
  0x16   : > { %v846_v43 = vld [vmem:[%s1071_s7] sm:$0xff] }
  0x17   : > { %629 = vmatpush.bf16.msra.mxu3 %v852_v29  ;;  %v877_v45 = vld [vmem:[%s1070_s6] ss:$0 sm:$0xff] }
  0x18   : > { %545 = vmatpush.bf16.msra.mxu2 %v843_v14  ;;  %v878_v52 = vld [vmem:[%s1072_s8] ss:$0 sm:$0xff] }
  0x19   : > { %461 = vmatpush.bf16.msra.mxu1 %v834_v7 }
  0x1b   : > { %630 = vmatpush.bf16.msra.mxu3 %v851_v30 }
  0x1c   : > { %546 = vmatpush.bf16.msra.mxu2 %v842_v15 }
  0x1d   : > { %462 = vmatpush.bf16.msra.mxu1 %v833_v8 }
  0x1f   : > { %631 = vmatpush.bf16.msra.mxu3 %v850_v31 }
  0x20   : > { %547 = vmatpush.bf16.msra.mxu2 %v841_v24 }
  0x21   : > { %463 = vmatpush.bf16.msra.mxu1 %v832_v9 }
  0x23   : > { %632 = vmatpush.bf16.msra.mxu3 %v849_v40 }
  0x24   : > { %548 = vmatpush.bf16.msra.mxu2 %v840_v25 }
  0x25   : > { %464 = vmatpush.bf16.msra.mxu1 %v831_v10 }
  0x27   : > { %633 = vmatpush.bf16.msra.mxu3 %v848_v41 }
  0x28   : > { %549 = vmatpush.bf16.msra.mxu2 %v839_v26 }
  0x29   : > { %465 = vmatpush.bf16.msra.mxu1 %v830_v11 }
  0x2b   : > { %634 = vmatpush.bf16.msra.mxu3 %v847_v42 }
  0x2c   : > { %550 = vmatpush.bf16.msra.mxu2 %v838_v27 }
  0x2f   : > { %635 = vmatpush.bf16.msra.mxu3 %v846_v43 }
  0x92   : > { %v382_v16 = vpop.f32.mrf.mxu0 }
  0x93   : > { %v383_v18 = vadd.f32 %v875_v17, %v382_v16 }
  0x95   : > { %v387_v21 = vmax.f32 %v383_v18, 0.0 }
  0x9a   : > { %v384_v19 = vpop.f32.mrf.mxu0 }
  0x9b   : > { %v385_v20 = vadd.f32 %v875_v17, %v384_v19 }
  0x9d   : > { %v388_v22 = vmax.f32 %v385_v20, 0.0 }
  0x9f   : > { %v389_v23 = vpack.c.bf16 %v388_v22, %v387_v21 }
  0xa1   : > { %466 = vmatmul.bf16.vlgmr.msra.gmra.mxu1 %v389_v23 }
 0x11e   : > { %v467_v32 = vpop.f32.mrf.mxu1 }
 0x11f   : > { %v468_v34 = vadd.f32 %v876_v33, %v467_v32 }
 0x121   : > { %v472_v37 = vmax.f32 %v468_v34, 0.0 }
 0x126   : > { %v469_v35 = vpop.f32.mrf.mxu1 }
 0x127   : > { %v470_v36 = vadd.f32 %v876_v33, %v469_v35 }
 0x129   : > { %v473_v38 = vmax.f32 %v470_v36, 0.0 }
 0x12b   : > { %v474_v39 = vpack.c.bf16 %v473_v38, %v472_v37 }
 0x12d   : > { %551 = vmatmul.bf16.vlgmr.msra.gmra.mxu2 %v474_v39 }
 0x1b0   : > { %v552_v44 = vpop.f32.mrf.mxu2 }
 0x1b1   : > { %v553_v46 = vadd.f32 %v877_v45, %v552_v44 }
 0x1b3   : > { %v557_v49 = vmax.f32 %v553_v46, 0.0 }
 0x1b8   : > { %v554_v47 = vpop.f32.mrf.mxu2 }
 0x1b9   : > { %v555_v48 = vadd.f32 %v877_v45, %v554_v47 }
 0x1bb   : > { %v558_v50 = vmax.f32 %v555_v48, 0.0 }
 0x1bd   : > { %v559_v51 = vpack.c.bf16 %v558_v50, %v557_v49 }
 0x1bf   : > { %636 = vmatmul.bf16.vlgmr.msra.gmra.mxu3 %v559_v51 }
 0x242   : > { %v637_v53 = vpop.f32.mrf.mxu3 }
 0x243   : > { %v638_v54 = vadd.f32 %v878_v52, %v637_v53 }
 0x245   : > { %v642_v55 = vmax.f32 %v638_v54, 0.0 }
 0x247   : > { %645 = vst.msk [vmem:[%s351_s11] sm:$0xff] %vm644_vm1, %v642_v55 }
 0x24a   : > { %v639_v56 = vpop.f32.mrf.mxu3 }
 0x24b   : > { %v640_v57 = vadd.f32 %v878_v52, %v639_v56 }
 0x24d   : > { %v643_v58 = vmax.f32 %v640_v57, 0.0 }
 0x24f   : > { %646 = vst.msk [vmem:[%s351_s11 + $0x8] sm:$0xff] %vm644_vm1, %v643_v58 }
 0x250 PF: > { %s20_s30 = sadd.s32 1, %s919_s30  }
 0x251   : > { %p17_p7 = scmp.ge.s32.totalorder %s20_s30, 4  }
 0x253   :  { %19 = sbr.rel (!%p17_p7) target bundleno = 1 (0x1), region = 91 }
 0x258   :  { %669 = vsyncpa [#allocation3], 1 }
 0x259   :  { %671 = vsyncpa [#allocation3 + $0x1], 1 }

</bundles_post_ra>
